<compile_context>
chip_gen: v5e
topology: v5e:2x2
jax: 0.10.0
libtpu: 0.0.40
codegen_flags: <defaults>
</compile_context>

<pallas_src>
import jax
import jax.numpy as jnp
from jax.experimental import pallas as pl
from jax.experimental.pallas import tpu as pltpu

_EPS = 1e-12  # torch.nn.functional.normalize default eps


def _l2norm_kernel(x_ref, o_ref):
    # Square, per-row reduce, clamped rsqrt (EUP), scale.
    x = x_ref[...].astype(jnp.float32)
    sq_sum = jnp.sum(x * x, axis=1, keepdims=True)            # [tm, 1]
    # clamp sq_sum at eps^2  ==  clamp ||x|| at eps (eps^2 = 1e-24 is a
    # normal f32, so this is numerically equivalent for f32 inputs).
    inv = jax.lax.rsqrt(jnp.maximum(sq_sum, _EPS * _EPS))     # EUP slot
    o_ref[...] = (x * inv).astype(o_ref.dtype)


def _round_up(x, m):
    return ((x + m - 1) // m) * m


def _pick_tm(N, D, itemsize):
    """Row-tile size as a function of D: ~4 MiB per block.

    Double-buffered in + out => ~16 MiB pipelined footprint, which fits
    comfortably on v5e/v6e (128 MiB VMEM) and v7x (64 MiB VMEM) while being
    large enough to amortize the ~0.35 us per-grid-step overhead (>=85% of
    HBM roofline in measurements).
    """
    target_block_bytes = 4 * 1024 * 1024
    # Sublane packing: 8 rows/vreg at 32-bit, 16 at 16-bit (bf16), 32 at 8-bit.
    sublane = max(8, 32 // max(1, itemsize))
    tm = max(sublane, target_block_bytes // max(1, D * itemsize))
    tm = (tm // sublane) * sublane
    # No point tiling beyond the (sublane-rounded) batch size.
    tm = min(tm, _round_up(N, sublane))
    return tm


def l2norm(x, *, tm=None):
    """L2-normalize x along dim=1 of an [N, D] array (p=2, eps=1e-12)."""
    N, D = x.shape
    if tm is None:
        tm = _pick_tm(N, D, x.dtype.itemsize)
    grid = (pl.cdiv(N, tm),)  # partial last block handled by Pallas masking
    return pl.pallas_call(
        _l2norm_kernel,
        out_shape=jax.ShapeDtypeStruct((N, D), x.dtype),
        grid_spec=pltpu.PrefetchScalarGridSpec(
            num_scalar_prefetch=0,
            grid=grid,
            in_specs=[pl.BlockSpec((tm, D), lambda i: (i, 0))],
            out_specs=pl.BlockSpec((tm, D), lambda i: (i, 0)),
        ),
        compiler_params=pltpu.CompilerParams(
            # Row axis is embarrassingly parallel -> shard across TCs on v7x.
            dimension_semantics=("parallel",),
            # Raise scoped VMEM so the ~16 MiB double-buffered footprint (and
            # larger manual tm overrides) always fit; stays under v7x's
            # 64 MiB physical VMEM.
            vmem_limit_bytes=48 * 1024 * 1024,
        ),
    )(x)


def _ref_l2norm(x):
    # Plain JAX mirror of torch.nn.functional.normalize(p=2, dim=1).
    norm = jnp.sqrt(jnp.sum(x.astype(jnp.float32) ** 2, axis=1, keepdims=True))
    return (x.astype(jnp.float32) / jnp.maximum(norm, _EPS)).astype(x.dtype)


if __name__ == "__main__":
    key = jax.random.PRNGKey(0)
    k0, k1 = jax.random.split(key)

    # Small, lane-dense shape consistent with L2Norm(dim=1) on an [N, D]
    # projector output (D multiple of 128 -> unmasked full-lane stores).
    x = jax.random.normal(k0, (16, 256), dtype=jnp.float32)
    out = jax.block_until_ready(l2norm(x))
    ref = _ref_l2norm(x)
    assert out.shape == x.shape and out.dtype == x.dtype
    assert jnp.allclose(out, ref, atol=1e-5, rtol=1e-5)

    # Exercise the cdiv / partial-last-block path with an explicit small tile.
    x2 = jax.random.normal(k1, (40, 128), dtype=jnp.float32)
    out2 = jax.block_until_ready(l2norm(x2, tm=16))  # grid = 3, last block partial
    ref2 = _ref_l2norm(x2)
    assert jnp.allclose(out2, ref2, atol=1e-5, rtol=1e-5)

    print("KERNEL_OK")
</pallas_src>

<mosaic_0001>
module attributes {stable_mosaic.version = 11 : i64} {
  func.func @_l2norm_kernel(%arg0: i32, %arg1: memref<16x256xf32, #tpu.memory_space<vmem>>, %arg2: memref<16x256xf32, #tpu.memory_space<vmem>>) attributes {dimension_semantics = [#tpu.dimension_semantics<parallel>], iteration_bounds = array<i64: 1>, scalar_prefetch = 0 : i64, scratch_operands = 0 : i64, tpu.core_type = #tpu.core_type<tc>, window_params = [{transform_indices = @transform_0, window_bounds = array<i64: 16, 256>}, {transform_indices = @transform_1, window_bounds = array<i64: 16, 256>}]} {
    %c0 = arith.constant 0 : index
    %c0_0 = arith.constant 0 : index
    %0 = vector.load %arg1[%c0, %c0_0] : memref<16x256xf32, #tpu.memory_space<vmem>>, vector<16x256xf32>
    %1 = arith.mulf %0, %0 : vector<16x256xf32>
    %cst = arith.constant dense<0.000000e+00> : vector<16xf32>
    %2 = vector.multi_reduction <add>, %1, %cst [1] : vector<16x256xf32> to vector<16xf32>
    %3 = vector.shape_cast %2 : vector<16xf32> to vector<16x1xf32>
    %cst_1 = arith.constant 1.000000e-24 : f32
    %4 = vector.broadcast %cst_1 : f32 to vector<16x1xf32>
    %5 = arith.maximumf %3, %4 : vector<16x1xf32>
    %6 = math.rsqrt %5 : vector<16x1xf32>
    %7 = vector.broadcast %6 : vector<16x1xf32> to vector<16x256xf32>
    %8 = arith.mulf %0, %7 : vector<16x256xf32>
    %c0_2 = arith.constant 0 : index
    %c0_3 = arith.constant 0 : index
    %9 = vector.load %arg2[%c0_2, %c0_3] : memref<16x256xf32, #tpu.memory_space<vmem>>, vector<16x256xf32>
    tpu.vector_store %arg2[%c0_2, %c0_3], %8 {strides = array<i32>} : memref<16x256xf32, #tpu.memory_space<vmem>>, vector<16x256xf32>,
    return
  }
  func.func @transform_0(%arg0: i32) -> (i32, i32) {
    %c0_i32 = arith.constant 0 : i32
    %c0_i32_0 = arith.constant 0 : i32
    return %arg0, %c0_i32 : i32, i32
  }
  func.func @transform_1(%arg0: i32) -> (i32, i32) {
    %c0_i32 = arith.constant 0 : i32
    %c0_i32_0 = arith.constant 0 : i32
    return %arg0, %c0_i32 : i32, i32
  }
}

</mosaic_0001>

<bundles_post_ra>
// kernel: tpu_custom_call.1
= control target key start
LH: loop header
LB: loop body
LE: loop exit
PB: predicated region body
PF: predicated region fallthrough
CT: control target
= control target key end

     0   :  { %6 = vsyncpa [#allocation3], 0  ;;  %s174_s0 = inlined_call_operand.hbm [shape: f32[16,256], index: 0, kind: input, shape index: {}]   ;;  %s175_s1 = inlined_call_operand.hbm [shape: f32[16,256], index: 1, kind: output, shape index: {}]  }
   0x1   :  { %7 = vsyncpa [#allocation4], 0  ;;  %s12_s8 = sshll.u32 %s174_s0, 4  ;;  %s148_s9 = smov [#allocation2]   ;;  %s13_s8 = int_to_ptr.hbm [resolvable:$true] %s12_s8 }
   0x2   :  { %s14_s10 = sshll.u32 %s148_s9, 4  ;;  %s149_s11 = smov 256   ;;  %s15_s10 = int_to_ptr.vmem [resolvable:$true] %s14_s10 }
   0x3   :  { %s150_s12 = smov 16  }
   0x4   :  { %20 = dma.hbm_to_vmem [thread:$0]  %s13_s8, 512, %s15_s10, [#allocation3], %s149_s11, %s149_s11, %s150_s12  }
   0x5   :  { %144 = dma.done.wait [#allocation3], 512  }
   0x6   :  { %145 = vsyncadd [#allocation3], 4294966784  ;;  %v25_v0 = vld [vmem:[#allocation2] sm:$0xff]  ;;  %v26_v1 = vld [vmem:[#allocation2 + $0x8] sm:$0xff]  ;;  %s151_s0 = smov [#allocation5]   ;;  %s75_s16 = sshll.u32 %s175_s1, 4  ;;  %s76_s16 = int_to_ptr.hbm [resolvable:$true] %s75_s16 }
   0x7   :  { %v29_v2 = vmul.f32 %v25_v0, %v25_v0  ;;  %v30_v3 = vmul.f32 %v26_v1, %v26_v1  ;;  %v27_v4 = vld [vmem:[#allocation2 + $0x10] sm:$0xff]  ;;  %v28_v5 = vld [vmem:[#allocation2 + $0x18] sm:$0xff]  ;;  %s73_s13 = sshll.u32 %s151_s0, 4  ;;  %s74_s13 = int_to_ptr.vmem [resolvable:$true] %s73_s13 }
   0x8   :  { %v31_v7 = vmul.f32 %v27_v4, %v27_v4  ;;  %v32_v8 = vmul.f32 %v28_v5, %v28_v5 }
   0x9   :  { %v33_v6 = vadd.f32 %v30_v3, %v29_v2 }
   0xa   :  { %v36_v9 = vadd.f32 %v32_v8, %v31_v7 }
   0xb   :  { %34 = vadd.xlane.f32.xlu0 %v33_v6 }
  0x13   :  { %37 = vadd.xlane.f32.xlu0 %v36_v9 }
  0x7e   :  { %v35_v10 = vpop.xlane.xlu0 %34 }
  0x7f   :  { %v39_v11 = vmax.f32 %v35_v10, 1e-24 }
  0x81   :  { %92 = vrsqrt.f32 %v39_v11  ;;  %vm47_vm1 = vweird.f32 %v39_v11 }
  0x86   :  { %v38_v12 = vpop.xlane.xlu0 %37 }
  0x87   :  { %v93_v13 = vpop.eup %92  ;;  %v40_v14 = vmax.f32 %v38_v12, 1e-24 }
  0x88   :  { %v42_v15 = vmul.f32 %v93_v13, %v39_v11  ;;  %vm48_vm0 = vweird.f32 %v93_v13 }
  0x89   :  { %94 = vrsqrt.f32 %v40_v14  ;;  %vm49_vm2 = vmor %vm47_vm1, %vm48_vm0  ;;  %vm57_vm4 = vweird.f32 %v40_v14 }
  0x8a   :  { %v43_v16 = vmul.f32 %v93_v13, %v42_v15 }
  0x8c   :  { %v44_v17 = vmul.f32 0.5, %v43_v16 }
  0x8e   :  { %v45_v18 = vsub.f32 1.5, %v44_v17 }
  0x8f   :  { %v95_v19 = vpop.eup %94 }
  0x90   :  { %v46_v20 = vmul.f32 %v93_v13, %v45_v18  ;;  %v52_v21 = vmul.f32 %v95_v19, %v40_v14  ;;  %vm58_vm3 = vweird.f32 %v95_v19 }
  0x91   :  { %vm59_vm5 = vmor %vm57_vm4, %vm58_vm3 }
  0x92   :  { %v50_v22 = vsel %vm49_vm2, %v93_v13, %v46_v20  ;;  %v53_v23 = vmul.f32 %v95_v19, %v52_v21 }
  0x93   :  { %v61_v24 = vmul.f32 %v50_v22, %v25_v0  ;;  %v62_v25 = vmul.f32 %v50_v22, %v26_v1 }
  0x94   :  { %v54_v26 = vmul.f32 0.5, %v53_v23 }
  0x95   :  { %65 = vst [vmem:[#allocation5] sm:$0xff] %v61_v24 }
  0x96   :  { %66 = vst [vmem:[#allocation5 + $0x8] sm:$0xff] %v62_v25  ;;  %v55_v27 = vsub.f32 1.5, %v54_v26 }
  0x98   :  { %v56_v28 = vmul.f32 %v95_v19, %v55_v27 }
  0x9a   :  { %v60_v29 = vsel %vm59_vm5, %v95_v19, %v56_v28 }
  0x9b   :  { %v63_v30 = vmul.f32 %v60_v29, %v27_v4  ;;  %v64_v31 = vmul.f32 %v60_v29, %v28_v5 }
  0x9d   :  { %67 = vst [vmem:[#allocation5 + $0x10] sm:$0xff] %v63_v30 }
  0x9e   :  { %68 = vst [vmem:[#allocation5 + $0x18] sm:$0xff] %v64_v31 }
  0x9f   :  { %81 = dma.vmem_to_hbm [thread:$0]  %s74_s13, 512, %s76_s16, [#allocation4], %s149_s11, %s149_s11, %s150_s12  }
  0xa0   :  { %146 = dma.done.wait [#allocation4], 512  }
  0xa1   :  { %147 = vsyncadd [#allocation4], 4294966784 }
  0xa2   :  { %86 = vsyncpa [#allocation3], 1 }
  0xa3   :  { %87 = vsyncpa [#allocation4], 1 }

</bundles_post_ra>
